<compile_context>
chip_gen: v7x
topology: tpu7x:2x2x1
jax: 0.10.0
libtpu: 0.0.40
codegen_flags: <defaults>
</compile_context>

<pallas_src>
import math

import jax
import jax.numpy as jnp
from jax.experimental import pallas as pl
from jax.experimental.pallas import tpu as pltpu


def _topk_kernel(emb_ref, sc_ref, out_ref):
    """One block of TB independent TopK instances, fully vectorized (no serial loops)."""
    TB, N, Fp = emb_ref.shape
    k = out_ref.shape[1]

    emb = emb_ref[...]                                    # (TB, N, Fp) f32
    sc_row = sc_ref[0:1, :].reshape(1, 1, Fp)             # (1, 1, Fp)  scorer^T (zero padded)

    # --- raw scores, exact f32 on the VPU (no matmul, no transposes) ------------
    # s_col[b, j, 0] = <emb[b, j, :], scorer>
    s_col = jnp.sum(emb * sc_row, axis=2, keepdims=True)                 # (TB, N, 1)

    # Same values laid along lanes via an exact diagonal-select (avoids a tiny
    # transpose and avoids a second, differently-rounded score computation).
    j_iota = jax.lax.broadcasted_iota(jnp.int32, (TB, N, N), 1)
    i_iota = jax.lax.broadcasted_iota(jnp.int32, (TB, N, N), 2)
    s_row = jnp.sum(jnp.where(j_iota == i_iota, s_col, 0.0),
                    axis=1, keepdims=True)                               # (TB, 1, N)

    # --- one-shot rank-based top-k selection (no loop-carried chain) ------------
    # rank[b, i] = #{ j : s_j > s_i  or  (s_j == s_i and j < i) }  (lowest-index tie break)
    beats = (s_col > s_row) | ((s_col == s_row) & (j_iota < i_iota))     # (TB, N, N)
    rank = jnp.sum(beats.astype(jnp.float32), axis=1, keepdims=True)     # (TB, 1, N)

    # Normalization only matters inside tanh; 1/||scorer|| from the single scorer row.
    inv_norm = jax.lax.rsqrt(jnp.sum(sc_row * sc_row, axis=2, keepdims=True))  # (1, 1, 1)
    tanh_all = jnp.tanh(s_row * inv_norm)                                # (TB, 1, N)

    # -inf filter + pad_with_last_val: ranks past the last finite score reuse it.
    # TODO(synk): if ALL scores are -inf the rows become zeros (torch would error anyway).
    n_valid = jnp.sum((s_row > -jnp.inf).astype(jnp.float32),
                      axis=2, keepdims=True)                             # (TB, 1, 1)
    r_iota = jax.lax.broadcasted_iota(jnp.int32, (TB, k, 1), 1).astype(jnp.float32)
    eff_r = jnp.minimum(r_iota, n_valid - 1.0)                           # (TB, k, 1)

    # Scaled one-hot selection matrix; row gather + tanh scaling fused in ONE MXU pass.
    wt = jnp.where(rank == eff_r, tanh_all, 0.0)                         # (TB, k, N)
    out_ref[...] = jnp.einsum('bkn,bnf->bkf', wt, emb,
                              preferred_element_type=jnp.float32)        # (TB, k, Fp)


def topk_forward_batched(node_embs, scorer, k, *, block_b=8):
    """Batched TopK.forward.  node_embs: (B, N, F).  Returns (B, F, k) (per-instance out.t())."""
    B, N, F = node_embs.shape
    Fp = ((F + 127) // 128) * 128                   # lane-dense feature dim: 136 -> 256
    block_b = min(block_b, B)
    Bp = ((B + block_b - 1) // block_b) * block_b   # pad batch to whole blocks

    emb = jnp.zeros((Bp, N, Fp), jnp.float32).at[:B, :, :F].set(node_embs.astype(jnp.float32))
    sc_pad = jnp.zeros((8, Fp), jnp.float32).at[0, :F].set(scorer.reshape(-1).astype(jnp.float32))

    out = pl.pallas_call(
        _topk_kernel,
        out_shape=jax.ShapeDtypeStruct((Bp, k, Fp), jnp.float32),
        grid=(Bp // block_b,),
        in_specs=[pl.BlockSpec((block_b, N, Fp), lambda b: (b, 0, 0)),
                  pl.BlockSpec((8, Fp), lambda b: (0, 0))],
        out_specs=pl.BlockSpec((block_b, k, Fp), lambda b: (b, 0, 0)),
        compiler_params=pltpu.CompilerParams(
            dimension_semantics=("parallel",),        # shards batch across both TCs on v7x
            vmem_limit_bytes=32 * 1024 * 1024),       # explicit; safe for v7x's 64 MiB physical
    )(emb, sc_pad)

    # Slice off lane/batch padding; the per-instance transpose to (F, k) is
    # wrapper-side layout plumbing (kernel stores the lane-dense (k, Fp) layout).
    return jnp.swapaxes(out[:B, :, :F], 1, 2)


def topk_forward(node_embs, scorer, k):
    """Single-instance TopK.forward: node_embs (N, F) -> (F, k), like torch's `out.t()`."""
    return topk_forward_batched(node_embs[None], scorer, k, block_b=1)[0]


if __name__ == "__main__":
    FEATS, N_NODES, K, BATCH = 136, 16, 8, 8    # feats forced to 136 by `.view(-1, 136)`

    key = jax.random.PRNGKey(0)
    k_emb, k_sc = jax.random.split(key)
    node_embs = jax.random.normal(k_emb, (BATCH, N_NODES, FEATS), jnp.float32)
    stdv = 1.0 / math.sqrt(FEATS)               # reset_param: uniform(-1/sqrt(feats), +1/sqrt(feats))
    scorer = jax.random.uniform(k_sc, (FEATS, 1), jnp.float32, minval=-stdv, maxval=stdv)

    out_b = topk_forward_batched(node_embs, scorer, K, block_b=4)   # grid of 2 parallel blocks
    jax.block_until_ready(out_b)

    # pure-JAX reference of the torch forward (finite inputs -> no -inf padding path)
    def ref_one(e):
        raw = jnp.sum(e * scorer.reshape(-1), axis=-1)
        scores = raw / jnp.linalg.norm(scorer)
        _, idx = jax.lax.top_k(scores, K)
        return (e[idx] * jnp.tanh(scores[idx])[:, None]).T

    ref_b = jax.vmap(ref_one)(node_embs)
    assert out_b.shape == (BATCH, FEATS, K)
    max_err = float(jnp.max(jnp.abs(out_b - ref_b)))
    assert jnp.allclose(out_b, ref_b, atol=2e-2, rtol=2e-2), max_err

    out1 = topk_forward(node_embs[0], scorer, K)     # module-equivalent single-instance API
    jax.block_until_ready(out1)
    assert out1.shape == (FEATS, K)
    assert jnp.allclose(out1, ref_one(node_embs[0]), atol=2e-2, rtol=2e-2)

    print("KERNEL_OK")
</pallas_src>

<mosaic_0001>
module attributes {stable_mosaic.version = 11 : i64} {
  func.func @_topk_kernel(%arg0: i32, %arg1: memref<4x16x256xf32, #tpu.memory_space<vmem>>, %arg2: memref<8x256xf32, #tpu.memory_space<vmem>>, %arg3: memref<4x8x256xf32, #tpu.memory_space<vmem>>) attributes {dimension_semantics = [#tpu.dimension_semantics<parallel>], iteration_bounds = array<i64: 2>, scalar_prefetch = 0 : i64, scratch_operands = 0 : i64, tpu.core_type = #tpu.core_type<tc>, window_params = [{transform_indices = @transform_0, window_bounds = array<i64: 4, 16, 256>}, {pipeline_mode = #tpu.pipeline_mode<synchronous>, transform_indices = @transform_1, window_bounds = array<i64: 8, 256>}, {transform_indices = @transform_2, window_bounds = array<i64: 4, 8, 256>}]} {
    %c0 = arith.constant 0 : index
    %c0_0 = arith.constant 0 : index
    %c0_1 = arith.constant 0 : index
    %0 = vector.load %arg1[%c0, %c0_0, %c0_1] : memref<4x16x256xf32, #tpu.memory_space<vmem>>, vector<4x16x256xf32>
    %c0_2 = arith.constant 0 : index
    %c0_3 = arith.constant 0 : index
    %1 = vector.load %arg2[%c0_2, %c0_3] : memref<8x256xf32, #tpu.memory_space<vmem>>, vector<1x256xf32>
    %2 = vector.shape_cast %1 : vector<1x256xf32> to vector<1x1x256xf32>
    %3 = vector.broadcast %2 : vector<1x1x256xf32> to vector<4x16x256xf32>
    %4 = arith.mulf %0, %3 : vector<4x16x256xf32>
    %cst = arith.constant dense<0.000000e+00> : vector<4x16xf32>
    %5 = vector.multi_reduction <add>, %4, %cst [2] : vector<4x16x256xf32> to vector<4x16xf32>
    %6 = vector.shape_cast %5 : vector<4x16xf32> to vector<4x16x1xf32>
    %7 = tpu.iota {dimensions = array<i32: 1>} : vector<4x16x16xi32>
    %8 = tpu.iota {dimensions = array<i32: 2>} : vector<4x16x16xi32>
    %9 = arith.cmpi eq, %7, %8 : vector<4x16x16xi32>
    %cst_4 = arith.constant 0.000000e+00 : f32
    %10 = vector.shape_cast %6 : vector<4x16x1xf32> to vector<4x16x1xf32>
    %11 = vector.broadcast %10 : vector<4x16x1xf32> to vector<4x16x16xf32>
    %12 = vector.broadcast %cst_4 : f32 to vector<4x16x16xf32>
    %13 = arith.select %9, %11, %12 : vector<4x16x16xi1>, vector<4x16x16xf32>
    %cst_5 = arith.constant dense<0.000000e+00> : vector<4x16xf32>
    %14 = vector.multi_reduction <add>, %13, %cst_5 [1] : vector<4x16x16xf32> to vector<4x16xf32>
    %15 = vector.shape_cast %14 : vector<4x16xf32> to vector<4x1x16xf32>
    %16 = vector.broadcast %6 : vector<4x16x1xf32> to vector<4x16x16xf32>
    %17 = vector.broadcast %15 : vector<4x1x16xf32> to vector<4x16x16xf32>
    %18 = arith.cmpf ogt, %16, %17 : vector<4x16x16xf32>
    %19 = vector.broadcast %6 : vector<4x16x1xf32> to vector<4x16x16xf32>
    %20 = vector.broadcast %15 : vector<4x1x16xf32> to vector<4x16x16xf32>
    %21 = arith.cmpf oeq, %19, %20 : vector<4x16x16xf32>
    %22 = arith.cmpi slt, %7, %8 : vector<4x16x16xi32>
    %23 = arith.andi %21, %22 : vector<4x16x16xi1>
    %24 = arith.ori %18, %23 : vector<4x16x16xi1>
    %25 = arith.extui %24 : vector<4x16x16xi1> to vector<4x16x16xi32>
    %26 = arith.sitofp %25 : vector<4x16x16xi32> to vector<4x16x16xf32>
    %cst_6 = arith.constant dense<0.000000e+00> : vector<4x16xf32>
    %27 = vector.multi_reduction <add>, %26, %cst_6 [1] : vector<4x16x16xf32> to vector<4x16xf32>
    %28 = vector.shape_cast %27 : vector<4x16xf32> to vector<4x1x16xf32>
    %29 = arith.mulf %2, %2 : vector<1x1x256xf32>
    %cst_7 = arith.constant dense<0.000000e+00> : vector<1x1xf32>
    %30 = vector.multi_reduction <add>, %29, %cst_7 [2] : vector<1x1x256xf32> to vector<1x1xf32>
    %31 = vector.shape_cast %30 : vector<1x1xf32> to vector<1x1x1xf32>
    %32 = math.rsqrt %31 : vector<1x1x1xf32>
    %33 = vector.broadcast %32 : vector<1x1x1xf32> to vector<4x1x16xf32>
    %34 = arith.mulf %15, %33 : vector<4x1x16xf32>
    %35 = math.tanh %34 : vector<4x1x16xf32>
    %cst_8 = arith.constant 0xFF800000 : f32
    %36 = vector.broadcast %cst_8 : f32 to vector<4x1x16xf32>
    %37 = arith.cmpf ogt, %15, %36 : vector<4x1x16xf32>
    %38 = arith.extui %37 : vector<4x1x16xi1> to vector<4x1x16xi32>
    %39 = arith.sitofp %38 : vector<4x1x16xi32> to vector<4x1x16xf32>
    %cst_9 = arith.constant dense<0.000000e+00> : vector<4x1xf32>
    %40 = vector.multi_reduction <add>, %39, %cst_9 [2] : vector<4x1x16xf32> to vector<4x1xf32>
    %41 = vector.shape_cast %40 : vector<4x1xf32> to vector<4x1x1xf32>
    %42 = tpu.iota {dimensions = array<i32: 1>} : vector<4x8x1xi32>
    %43 = arith.sitofp %42 : vector<4x8x1xi32> to vector<4x8x1xf32>
    %cst_10 = arith.constant 1.000000e+00 : f32
    %44 = vector.broadcast %cst_10 : f32 to vector<4x1x1xf32>
    %45 = arith.subf %41, %44 : vector<4x1x1xf32>
    %46 = vector.broadcast %45 : vector<4x1x1xf32> to vector<4x8x1xf32>
    %47 = arith.minimumf %43, %46 : vector<4x8x1xf32>
    %48 = vector.broadcast %28 : vector<4x1x16xf32> to vector<4x8x16xf32>
    %49 = vector.broadcast %47 : vector<4x8x1xf32> to vector<4x8x16xf32>
    %50 = arith.cmpf oeq, %48, %49 : vector<4x8x16xf32>
    %cst_11 = arith.constant 0.000000e+00 : f32
    %51 = vector.shape_cast %35 : vector<4x1x16xf32> to vector<4x1x16xf32>
    %52 = vector.broadcast %51 : vector<4x1x16xf32> to vector<4x8x16xf32>
    %53 = vector.broadcast %cst_11 : f32 to vector<4x8x16xf32>
    %54 = arith.select %50, %52, %53 : vector<4x8x16xi1>, vector<4x8x16xf32>
    "tpu.trace_start"() <{level = 10 : i32, message = "bkn,bnf->bkf"}> : () -> ()
    %cst_12 = arith.constant dense<0.000000e+00> : vector<4x8x256xf32>
    %55 = tpu.matmul %54, %0, %cst_12 {dimension_numbers = #tpu.dot_dimension_numbers<[2], [1], [1], [2], [0, 0, 0, 1, 1, 2], [0], [0]>} : vector<4x8x16xf32>, vector<4x16x256xf32>, vector<4x8x256xf32> -> vector<4x8x256xf32>
    "tpu.trace_stop"() : () -> ()
    %c0_13 = arith.constant 0 : index
    %c0_14 = arith.constant 0 : index
    %c0_15 = arith.constant 0 : index
    %56 = vector.load %arg3[%c0_13, %c0_14, %c0_15] : memref<4x8x256xf32, #tpu.memory_space<vmem>>, vector<4x8x256xf32>
    tpu.vector_store %arg3[%c0_13, %c0_14, %c0_15], %55 {strides = array<i32>} : memref<4x8x256xf32, #tpu.memory_space<vmem>>, vector<4x8x256xf32>,
    return
  }
  func.func @transform_0(%arg0: i32) -> (i32, i32, i32) {
    %c0_i32 = arith.constant 0 : i32
    %c0_i32_0 = arith.constant 0 : i32
    %c0_i32_1 = arith.constant 0 : i32
    return %arg0, %c0_i32, %c0_i32_0 : i32, i32, i32
  }
  func.func @transform_1(%arg0: i32) -> (i32, i32) {
    %c0_i32 = arith.constant 0 : i32
    %c0_i32_0 = arith.constant 0 : i32
    %c0_i32_1 = arith.constant 0 : i32
    return %c0_i32, %c0_i32_0 : i32, i32
  }
  func.func @transform_2(%arg0: i32) -> (i32, i32, i32) {
    %c0_i32 = arith.constant 0 : i32
    %c0_i32_0 = arith.constant 0 : i32
    %c0_i32_1 = arith.constant 0 : i32
    return %arg0, %c0_i32, %c0_i32_0 : i32, i32, i32
  }
}

</mosaic_0001>

<bundles_post_ra>
// kernel: tpu_custom_call.1
= control target key start
LH: loop header
LB: loop body
LE: loop exit
PB: predicated region body
PF: predicated region fallthrough
CT: control target
= control target key end

     0   :  { %7 = vsyncpa [#allocation3], 0  ;;  %s1646_s0 = inlined_call_operand.hbm [shape: f32[8,16,256], index: 0, kind: input, shape index: {}]   ;;  %s1647_s1 = inlined_call_operand.hbm [shape: f32[8,256], index: 1, kind: input, shape index: {}]   ;;  %s1648_s2 = inlined_call_operand.hbm [shape: f32[8,8,256], index: 2, kind: output, shape index: {}]  }
   0x1   :  { %9 = vsyncpa [#allocation3 + $0x1], 0 }
   0x2   :  { %10 = vsyncpa [#allocation6], 0 }
   0x3   :  { %11 = vsyncpa [#allocation4], 0 }
   0x4   :  { %13 = vsyncpa [#allocation4 + $0x1], 0  ;;  %s1153_s9 = smov 0   ;;  %s1155_s10 = smov 0  }
   0x5   :  { %s1157_s11 = smov 0   ;;  %s1159_s12 = smov 0  }
   0x6 LB: > { %s1174_s13 = sadd.s32 4294967295, %s1128_s12   ;;  %s870_s14 = sadd.s32 4294967294, %s1128_s12   ;;  %s1128_s12 = sphi %s1159_s12, %s1673_s12   ;;  %s1124_s11 = sphi %s1157_s11, %s1672_s11   ;;  %s1120_s10 = sphi %s1155_s10, %s1671_s10   ;;  %s1116_s9 = sphi %s1153_s9, %s1670_s9  }
   0x7   : > { %s1178_s15 = sadd.s32 1, %s1128_s12   ;;  %s26_s16 = sadd.s32 1, %s1124_s11 }
   0x8   : > { %s23_s17 = ssub.s32 %s1128_s12, %s1178_s15  ;;  %p33_p0 = scmp.ne.s32.totalorder %s1124_s11, %s1120_s10 }
   0x9   : > { %p24_p1 = scmp.eq.s32.totalorder %s23_s17, 0  ;;  %p34_p2 = scmp.eq.s32.totalorder %s1128_s12, 0 }
   0xa   : > { %p39_p3 = scmp.ne.s32.totalorder %s1120_s10, %s1116_s9  ;;  %p1649_p4 = scmp.eq.s32.totalorder %s1174_s13, 0 }
   0xb   : > { %s1190_s18 = scalar_select %p24_p1, %s1124_s11, %s26_s16  }
   0xc   : > { %p1192_p5 = por %p34_p2, %p33_p0  ;;  %p1198_p6 = por %p1649_p4, %p39_p3 }
   0xd   : > { %p84_p7 = scmp.eq.s32.totalorder %s1174_s13, 1  ;;  %p90_p8 = scmp.eq.s32.totalorder %s870_s14, 1 }
   0xe   : > { %s1655_s20 = scalar_select %p1198_p6, 1, 0 }
   0xf   : > { %p871_p9 = scmp.ge.s32.totalorder %s1128_s12, 1  ;;  %p97_p10 = scmp.lt.s32.totalorder %s1128_s12, 3 }
  0x10   : > { %p1205_p11 = por %p84_p7, %p33_p0  ;;  %p1209_p12 = por %p90_p8, %p39_p3 }
  0x11   : > { %p1213_p13 = pnand %p871_p9, %p97_p10  ;;  %s1130_s24 = smov [#allocation5]  }
  0x12   : > { %s1656_s21 = scalar_select %p1205_p11, 1, 0 }
  0x13   : > { %s1657_s22 = scalar_select %p1209_p12, 1, 0 }
  0x14   : > { %s1658_s23 = scalar_select %p1213_p13, 1, 0 }
  0x15   : > { %p936_p2 = pneg %p1213_p13  ;;  %s110_s25 = sshll.u32 %s1130_s24, 4  ;;  %s111_s25 = int_to_ptr.vmem [resolvable:$true] %s110_s25 }
  0x16   : > { %p949_p4 = scmp.lt.s32.totalorder %s1128_s12, 2  ;;  %p1659_p0 = scmp.eq.s32.totalorder %s1174_s13, 0 }
  0x17   : > { %s121_s27 = sand.u32 1, %s1124_s11   ;;  %s1000_s4 = scalar_lea.hbm %s1647_s1, 256 }
  0x18   : > { %p1223_p7 = pnand %p936_p2, %p1659_p0  ;;  %p1230_p3 = pnand %p949_p4, %p1192_p5 }
  0x19   : > { %s874_s29 = sshll.u32 %s121_s27, 7  ;;  %p1001_p8 = scmp.ne.s32.totalorder %s1647_s1, %s1000_s4 }
  0x1a   : > { %s1661_s28 = scalar_select %p1230_p3, 1, 0 }
  0x1b   : > { %p1002_p9 = pneg %p1223_p7  ;;  %p1007_p4 = scmp.lt.u32.totalorder %s1000_s4, %s1647_s1 }
  0x1d   : > { %p1003_p10 = pnand %p1002_p9, %p1001_p8 }
  0x1f   : > { %p1004_p2 = pneg %p1003_p10 }
  0x21   : > { %p1009_p5 = pnand %p1007_p4, %p1004_p2 }
  0x23   : > { %1012 = shalt.err (!%p1009_p5)
}
  0x24   : > { %s1013_s14 = scalar_lea.vmem %s111_s25, 256  ;;  %p1021_p11 = scmp.lt.s32.totalorder %s111_s25, %s111_s25 }
  0x25   : > { %p1014_p0 = scmp.ne.s32.totalorder %s111_s25, %s1013_s14  ;;  %p1022_p6 = scmp.lt.s32.totalorder %s1013_s14, %s1013_s14 }
  0x27   : > { %p1016_p1 = pnand %p1014_p0, %p1002_p9  ;;  %p1023_p13 = por %p1022_p6, %p1021_p11 }
  0x29   : > { %p1017_p12 = pneg %p1016_p1 }
  0x2b   : > { %p1024_p3 = pnand %p1023_p13, %p1017_p12 }
  0x2d   : > { %1027 = shalt.err (!%p1024_p3)
}
  0x2e   : > { %939 = dma.hbm_to_vmem [thread:$0]  (!%p1223_p7), %s1647_s1, 256, %s111_s25, [#allocation6]  }
  0x2f   : > { %s909_s19 = sshll.u32 %s1128_s12, 11  ;;  %s125_s24 = scalar_lea.vmem [#allocation2], %s874_s29 }
  0x30   : > { %s133_s30 = sshll.u32 %s125_s24, 4  ;;  %s1254_s5 = scalar_lea.hbm %s1646_s0, %s909_s19  ;;  %s1256_s30 = int_to_ptr.vmem [resolvable:$true] %s133_s30 }
  0x31   : > { %s1258_s26 = scalar_lea.sflag [#allocation3], %s121_s27  ;;  %s1028_s6 = scalar_lea.hbm %s1254_s5, 2048 }
  0x32   : > { %p1029_p6 = scmp.ne.s32.totalorder %s1254_s5, %s1028_s6  ;;  %p1662_p11 = scmp.ne.s32.totalorder %s1661_s28, 0 }
  0x33   : > { %s1033_s7 = scalar_lea.hbm %s1646_s0, 4096  ;;  %p1034_p7 = scmp.lt.u32.totalorder %s1254_s5, %s1646_s0 }
  0x34   : > { %p1030_p12 = pneg %p1662_p11  ;;  %p1035_p3 = scmp.lt.u32.totalorder %s1033_s7, %s1028_s6 }
  0x35   : > { %p1037_p9 = scmp.lt.u32.totalorder %s1028_s6, %s1254_s5 }
  0x36   : > { %p1031_p13 = pnand %p1030_p12, %p1029_p6  ;;  %p1036_p8 = por %p1035_p3, %p1034_p7 }
  0x38   : > { %p1032_p1 = pneg %p1031_p13  ;;  %p1038_p10 = por %p1037_p9, %p1036_p8 }
  0x3a   : > { %p1039_p2 = pnand %p1038_p10, %p1032_p1 }
  0x3c   : > { %1042 = shalt.err (!%p1039_p2)
}
  0x3d   : > { %s1043_s27 = scalar_lea.vmem %s1256_s30, 2048  ;;  %s1131_s16 = smov [#allocation2]  }
  0x3e   : > { %p1044_p4 = scmp.ne.s32.totalorder %s1256_s30, %s1043_s27  ;;  %s1048_s17 = sshll.u32 %s1131_s16, 4  ;;  %s1049_s17 = int_to_ptr.vmem [resolvable:$false] %s1048_s17 }
  0x3f   : > { %s1050_s19 = scalar_lea.vmem %s1049_s17, 4096  ;;  %p1051_p6 = scmp.lt.s32.totalorder %s1256_s30, %s1049_s17 }
  0x40   : > { %p1046_p5 = pnand %p1044_p4, %p1030_p12  ;;  %p1052_p13 = scmp.lt.s32.totalorder %s1050_s19, %s1043_s27 }
  0x42   : > { %p1047_p0 = pneg %p1046_p5  ;;  %p1053_p7 = por %p1052_p13, %p1051_p6 }
  0x44   : > { %p1054_p3 = pnand %p1053_p7, %p1047_p0 }
  0x46   : > { %1057 = shalt.err (!%p1054_p3)
}
  0x47   : > { %s1132_s24 = smov 256   ;;  %s1133_s3 = smov 16  }
  0x48   : > { %943 = dma.hbm_to_vmem [thread:$0]  (!%p1662_p11), %s1254_s5, 2048, %s1256_s30, %s1258_s26, %s1132_s24, %s1132_s24, %s1133_s3  }
  0x49   : > { %p1663_p12 = scmp.ne.s32.totalorder %s1658_s23, 0 }
  0x4a   : > { %s1289_s4 = sand.u32 (!%p1663_p12), 1, %s1120_s10   ;;  %p1664_p1 = scmp.ne.s32.totalorder (!%p1663_p12), %s1655_s20, 0 }
  0x4b   : > { %145 = sbr.rel (%p1663_p12) target bundleno = 651 (0x28b), region = 28  ;;  %s879_s6 = sshll.u32 (!%p1663_p12), %s1289_s4, 7 }
  0x4c   : > { %s148_s25 = scalar_lea.sflag (!%p1663_p12), [#allocation3], %s1289_s4  ;;  %s1293_s29 = scalar_lea.vmem (!%p1663_p12), [#allocation2], %s879_s6 }
  0x52   : > { %1103 = dma.done.wait (%p1664_p1), %s148_s25, 2048  }
  0x53   : > { %1105 = vsyncadd (%p1664_p1), %s148_s25, 4294965248  ;;  %p1665_p11 = scmp.eq.s32.totalorder %s1174_s13, 0 }
  0x55   : > { %1107 = dma.done.wait (%p1665_p11), [#allocation6], 256   ;;  %p1666_p8 = pmov %p1665_p11 }
  0x56   : > { %v196_v0 = vlaneseq  ;;  %v1311_v4 = vld [vmem:[%s1293_s29 + $0x20] sm:$0xff]  ;;  %v1314_v5 = vld [vmem:[%s1293_s29 + $0x28] sm:$0xff]  ;;  %v1324_v11 = vld [vmem:[%s1293_s29 + $0x30] sm:$0xff]  ;;  %vm396_vm0 = vcmask 1040384   ;;  %v1134_v57 = vmov 0.0   ;;  %vm261_vm4 = vcmask 130048  }
  0x57   : > { %1109 = vsyncadd (%p1666_p8), [#allocation6], 4294967040  ;;  %v194_v6 = vld [vmem:[#allocation5] ss:$8 sm:$0x3]  ;;  %v1327_v12 = vld [vmem:[%s1293_s29 + $0x38] sm:$0xff]  ;;  %535 = vmatprep.mubr.f32.mxu0 %v1134_v57  ;;  %609 = vmatprep.mubr.f32.mxu1 %v1134_v57 }
  0x58   : > { %v1304_v1 = vshrl.u32 %v196_v0, 7  ;;  %v1318_v9 = vld [vmem:[%s1293_s29] sm:$0xff]  ;;  %v1321_v10 = vld [vmem:[%s1293_s29 + $0x8] sm:$0xff]  ;;  %v1330_v13 = vld [vmem:[%s1293_s29 + $0x10] sm:$0xff]  ;;  %v384_v40 = vmul.f32 %v194_v6, %v194_v6  ;;  %v1381_v55 = vand.u32 127, %v196_v0  ;;  %s881_s20 = sshll.u32 %s1289_s4, 6 }
  0x59   : > { %v1333_v14 = vld [vmem:[%s1293_s29 + $0x18] sm:$0xff]  ;;  %v1340_v19 = vld [vmem:[%s1293_s29 + $0x50] sm:$0xff]  ;;  %v1346_v21 = vld [vmem:[%s1293_s29 + $0x40] sm:$0xff]  ;;  %s175_s23 = scalar_lea.vmem [#allocation7], %s881_s20  ;;  %s911_s30 = sshll.u32 %s1174_s13, 10 }
  0x5a   : > { %v1307_v2 = vsub.s32 0, %v1304_v1  ;;  %v202_v3 = vsub.s32 1, %v1304_v1  ;;  %v1343_v20 = vld [vmem:[%s1293_s29 + $0x58] sm:$0xff]  ;;  %v1353_v26 = vld [vmem:[%s1293_s29 + $0x48] sm:$0xff]  ;;  %v922_v35 = vpack.c.bf16 %v1340_v19, %v1346_v21  ;;  %v1362_v36 = vld [vmem:[%s1293_s29 + $0x70] sm:$0xff]  ;;  %v1384_v56 = vadd.s32 8, %v1304_v1  ;;  %s1602_s7 = scalar_lea.hbm %s1648_s2, %s911_s30 }
  0x5b   : > { %v1365_v37 = vld [vmem:[%s1293_s29 + $0x78] sm:$0xff]  ;;  %v1368_v38 = vld [vmem:[%s1293_s29 + $0x60] sm:$0xff]  ;;  %v1371_v39 = vld [vmem:[%s1293_s29 + $0x68] sm:$0xff]  ;;  %vm251_vm2 = vcmp.eq.s32.totalorder %v1304_v1, %v1381_v55  ;;  %vm314_vm5 = vcmp.lt.s32.totalorder %v1304_v1, %v1381_v55  ;;  %s787_s28 = sshll.u32 %s175_s23, 4  ;;  %s773_s8 = scalar_lea.sflag [#allocation4], %s1289_s4  ;;  %s1597_s28 = int_to_ptr.vmem [resolvable:$true] %s787_s28 }
  0x5c   : > { %v199_v7 = vrot.slane %v194_v6, %v1307_v2  ;;  %v203_v8 = vrot.slane %v194_v6, %v202_v3  ;;  %v926_v41 = vpack.c.bf16 %v1362_v36, %v1368_v38  ;;  %v389_v48 = vrot.slane %v384_v40, %v1307_v2  ;;  %s1058_s14 = scalar_lea.vmem %s1597_s28, 1024  ;;  %p1667_p10 = scmp.ne.s32.totalorder %s1656_s21, 0 }
  0x5d   : > { %v393_v49 = vrot.slane %v384_v40, %v202_v3  ;;  %vm315_vm1 = vcmp.lt.s32.totalorder %v1384_v56, %v1381_v55  ;;  %vm252_vm3 = vcmp.eq.s32.totalorder %v1384_v56, %v1381_v55  ;;  %v912_v55 = vpack.c.bf16 %v1333_v14, %v1321_v10  ;;  %p1059_p9 = scmp.ne.s32.totalorder %s1597_s28, %s1058_s14  ;;  %s1135_s13 = smov [#allocation7]  }
  0x5e   : > { %v210_v15 = vmul.f32 %v199_v7, %v1311_v4  ;;  %v211_v16 = vmul.f32 %v203_v8, %v1314_v5  ;;  %v206_v17 = vmul.f32 %v199_v7, %v1318_v9  ;;  %v207_v18 = vmul.f32 %v203_v8, %v1321_v10  ;;  %s1062_s27 = sshll.u32 %s1135_s13, 4  ;;  %s1063_s27 = int_to_ptr.vmem [resolvable:$false] %s1062_s27 }
  0x5f   : > { %v212_v22 = vmul.f32 %v199_v7, %v1324_v11  ;;  %v213_v23 = vmul.f32 %v203_v8, %v1327_v12  ;;  %v208_v24 = vmul.f32 %v199_v7, %v1330_v13  ;;  %v209_v25 = vmul.f32 %v203_v8, %v1333_v14  ;;  %913 = vmatprep.subr.bf16.mxu0 %v912_v55  ;;  %p1060_p2 = pnand %p1059_p9, %p1667_p10  ;;  %s1064_s16 = scalar_lea.vmem %s1063_s27, 2048 }
  0x60   : > { %v228_v27 = vadd.f32 %v211_v16, %v210_v15  ;;  %v222_v28 = vadd.f32 %v207_v18, %v206_v17  ;;  %v216_v29 = vmul.f32 %v199_v7, %v1340_v19  ;;  %v217_v30 = vmul.f32 %v203_v8, %v1343_v20  ;;  %p1065_p5 = scmp.lt.s32.totalorder %s1597_s28, %s1063_s27  ;;  %p1066_p0 = scmp.lt.s32.totalorder %s1064_s16, %s1058_s14 }
  0x61   : > { %v214_v31 = vmul.f32 %v199_v7, %v1346_v21  ;;  %v215_v32 = vmul.f32 %v203_v8, %v1353_v26  ;;  %v231_v33 = vadd.f32 %v213_v23, %v212_v22  ;;  %v225_v34 = vadd.f32 %v209_v25, %v208_v24  ;;  %p1061_p4 = pneg %p1060_p2 }
  0x62   : > { %229 = vadd.xlane.f32.xlu1 %v228_v27  ;;  %223 = vadd.xlane.f32.xlu0 %v222_v28  ;;  %v237_v42 = vadd.f32 %v217_v30, %v216_v29  ;;  %v220_v44 = vmul.f32 %v199_v7, %v1362_v36  ;;  %v221_v45 = vmul.f32 %v203_v8, %v1365_v37  ;;  %v397_v52 = vsel %vm396_vm0, %v389_v48, 0.0  ;;  %p1067_p6 = por %p1066_p0, %p1065_p5 }
  0x63   : > { %v234_v43 = vadd.f32 %v215_v32, %v214_v31  ;;  %v218_v46 = vmul.f32 %v199_v7, %v1368_v38  ;;  %v219_v47 = vmul.f32 %v203_v8, %v1371_v39  ;;  %v398_v53 = vsel %vm396_vm0, %v393_v49, 0.0 }
  0x64   : > { %v243_v50 = vadd.f32 %v221_v45, %v220_v44  ;;  %v399_v54 = vadd.f32 %v398_v53, %v397_v52  ;;  %v916_v56 = vpack.c.bf16 %v1327_v12, %v1314_v5  ;;  %v924_v10 = vpack.c.bf16 %v1365_v37, %v1371_v39  ;;  %p1068_p13 = pnand %p1067_p6, %p1061_p4 }
  0x65   : > { %v240_v51 = vadd.f32 %v219_v47, %v218_v46 }
  0x66   : > { %232 = vadd.xlane.f32.xlu1 %v231_v33  ;;  %226 = vadd.xlane.f32.xlu0 %v225_v34 }
  0x67   : > { %917 = vmatprep.subr.bf16.mxu1 %v916_v56 }
  0x6a   : > { %238 = vadd.xlane.f32.xlu1 %v237_v42  ;;  %235 = vadd.xlane.f32.xlu0 %v234_v43 }
  0x6e   : > { %244 = vadd.xlane.f32.xlu1 %v243_v50  ;;  %241 = vadd.xlane.f32.xlu0 %v240_v51 }
  0x72   : > { %400 = vadd.xlane.f32.xlu0 %v399_v54 }
  0xef   : > { %v1392_v58 = vpop.xlane.xlu1 %229  ;;  %v1394_v59 = vpop.xlane.xlu0 %223 }
  0xf0   : > { %v255_v60 = vsel %vm251_vm2, %v1392_v58, 0.0  ;;  %v253_v61 = vsel %vm251_vm2, %v1394_v59, 0.0 }
  0xf1   : > { %v271_v6 = vsel %vm261_vm4, %v255_v60, 0.0  ;;  %v262_v7 = vsel %vm261_vm4, %v253_v61, 0.0 }
  0xf3   : > { %v233_v62 = vpop.xlane.xlu1 %232  ;;  %v1406_v63 = vpop.xlane.xlu0 %226 }
  0xf4   : > { %v256_v0 = vsel %vm252_vm3, %v233_v62, 0.0  ;;  %v254_v3 = vsel %vm252_vm3, %v1406_v63, 0.0 }
  0xf5   : > { %v272_v8 = vsel %vm261_vm4, %v256_v0, 0.0  ;;  %v263_v15 = vsel %vm261_vm4, %v254_v3, 0.0 }
  0xf6   : > { %v273_v16 = vadd.f32 %v272_v8, %v271_v6  ;;  %v264_v17 = vadd.f32 %v263_v15, %v262_v7 }
  0xf7   : > { %v1419_v18 = vpop.xlane.xlu1 %238  ;;  %v1421_v22 = vpop.xlane.xlu0 %235 }
  0xf8   : > { %v274_v23 = vrot.slane %v273_v16, 4  ;;  %v265_v24 = vrot.slane %v264_v17, 4  ;;  %v258_v25 = vsel %vm252_vm3, %v1419_v18, 0.0  ;;  %v257_v27 = vsel %vm251_vm2, %v1421_v22, 0.0 }
  0xf9   : > { %v281_v28 = vsel %vm261_vm4, %v258_v25, 0.0  ;;  %v280_v29 = vsel %vm261_vm4, %v257_v27, 0.0 }
  0xfa   : > { %v275_v30 = vadd.f32 %v274_v23, %v273_v16  ;;  %v266_v31 = vadd.f32 %v265_v24, %v264_v17  ;;  %v282_v32 = vadd.f32 %v281_v28, %v280_v29 }
  0xfb   : > { %v1433_v33 = vpop.xlane.xlu1 %244  ;;  %v1435_v34 = vpop.xlane.xlu0 %241 }
  0xfc   : > { %v276_v40 = vrot.slane %v275_v30, 2  ;;  %v267_v42 = vrot.slane %v266_v31, 2  ;;  %v283_v43 = vrot.slane %v282_v32, 4  ;;  %v260_v44 = vsel %vm252_vm3, %v1433_v33, 0.0 }
  0xfd   : > { %v290_v45 = vsel %vm261_vm4, %v260_v44, 0.0  ;;  %v259_v46 = vsel %vm251_vm2, %v1435_v34, 0.0 }
  0xfe   : > { %v277_v47 = vadd.f32 %v276_v40, %v275_v30  ;;  %v268_v48 = vadd.f32 %v267_v42, %v266_v31  ;;  %v284_v49 = vadd.f32 %v283_v43, %v282_v32  ;;  %v289_v50 = vsel %vm261_vm4, %v259_v46, 0.0 }
  0xff   : > { %v291_v51 = vadd.f32 %v290_v45, %v289_v50  ;;  %v401_v14 = vpop.xlane.xlu0 %400 }
 0x100   : > { %v278_v52 = vrot.slane %v277_v47, 1  ;;  %v269_v53 = vrot.slane %v268_v48, 1  ;;  %v285_v54 = vrot.slane %v284_v49, 2  ;;  %990 = vrsqrt.f32 %v401_v14 }
 0x101   : > { %v292_v60 = vrot.slane %v291_v51, 4 }
 0x102   : > { %v1449_v61 = vadd.f32 %v278_v52, %v277_v47  ;;  %v1451_v0 = vadd.f32 %v269_v53, %v268_v48  ;;  %v286_v3 = vadd.f32 %v285_v54, %v284_v49  ;;  %v918_v54 = vpack.c.bf16 %v1324_v11, %v1311_v4 }
 0x103   : > { %v293_v6 = vadd.f32 %v292_v60, %v291_v51  ;;  %v920_v60 = vpack.c.bf16 %v1343_v20, %v1353_v26 }
 0x104   : > { %vm300_vm6 = vcmp.gt.f32.partialorder %v1392_v58, %v1449_v61  ;;  %vm301_vm7 = vcmp.gt.f32.partialorder %v233_v62, %v1449_v61  ;;  %vm308_vm8 = vcmp.eq.f32.partialorder %v1392_v58, %v1449_v61  ;;  %vm309_vm9 = vcmp.eq.f32.partialorder %v233_v62, %v1449_v61  ;;  %919 = vmatpush1.bf16.msra.mxu1 %v918_v54 }
 0x105   : > { %vm318_vm10 = vmand %vm308_vm8, %vm314_vm5  ;;  %vm298_vm11 = vcmp.gt.f32.partialorder %v1394_v59, %v1451_v0  ;;  %vm299_vm12 = vcmp.gt.f32.partialorder %v1406_v63, %v1451_v0  ;;  %vm306_vm13 = vcmp.eq.f32.partialorder %v1394_v59, %v1451_v0  ;;  %vm307_vm14 = vcmp.eq.f32.partialorder %v1406_v63, %v1451_v0  ;;  %925 = vmatprep.subr.bf16.mxu1 %v924_v10 }
 0x106   : > { %vm319_vm15 = vmand %vm309_vm9, %vm315_vm1  ;;  %v287_v58 = vrot.slane %v286_v3, 1  ;;  %v294_v7 = vrot.slane %v293_v6, 2  ;;  %vm412_vm0 = vcmp.gt.f32.partialorder %v1449_v61, -inf  ;;  %vm411_vm2 = vcmp.gt.f32.partialorder %v1451_v0, -inf }
 0x107   : > { %vm326_vm3 = vmor %vm300_vm6, %vm318_vm10  ;;  %v891_v8 = vsel %vm412_vm0, 1.0, %v1134_v57  ;;  %v890_v15 = vsel %vm411_vm2, 1.0, %v1134_v57 }
 0x108   : > { %vm327_vm8 = vmor %vm301_vm7, %vm319_vm15  ;;  %v884_v16 = vsel %vm326_vm3, 1.0, %v1134_v57  ;;  %v1480_v17 = vadd.f32 %v287_v58, %v286_v3  ;;  %v295_v23 = vadd.f32 %v294_v7, %v293_v6  ;;  %v426_v24 = vsel %vm261_vm4, %v891_v8, 0.0 }
 0x109   : > { %v885_v25 = vsel %vm327_vm8, 1.0, %v1134_v57  ;;  %v357_v27 = vsel %vm261_vm4, %v884_v16, 0.0  ;;  %vm316_vm6 = vmand %vm306_vm13, %vm314_vm5  ;;  %427 = vadd.xlane.f32.xlu0 %v426_v24  ;;  %v423_v62 = vsel %vm261_vm4, %v890_v15, 0.0 }
 0x10a   : > { %v358_v28 = vsel %vm261_vm4, %v885_v25, 0.0  ;;  %vm317_vm7 = vmand %vm307_vm14, %vm315_vm1  ;;  %vm302_vm9 = vcmp.gt.f32.partialorder %v1421_v22, %v1480_v17  ;;  %vm303_vm10 = vcmp.gt.f32.partialorder %v1419_v18, %v1480_v17  ;;  %vm310_vm13 = vcmp.eq.f32.partialorder %v1421_v22, %v1480_v17  ;;  %424 = vadd.xlane.f32.xlu1 %v423_v62  ;;  %v991_v12 = vpop.eup %990 }
 0x10b   : > { %v359_v29 = vadd.f32 %v358_v28, %v357_v27  ;;  %vm324_vm15 = vmor %vm298_vm11, %vm316_vm6  ;;  %vm311_vm0 = vcmp.eq.f32.partialorder %v1419_v18, %v1480_v17  ;;  %v296_v30 = vrot.slane %v295_v23, 1  ;;  %vm413_vm14 = vcmp.gt.f32.partialorder %v1480_v17, -inf }
 0x10c   : > { %vm325_vm2 = vmor %vm299_vm12, %vm317_vm7  ;;  %v882_v31 = vsel %vm324_vm15, 1.0, %v1134_v57  ;;  %v892_v32 = vsel %vm413_vm14, 1.0, %v1134_v57  ;;  %v404_v4 = vmul.f32 %v991_v12, %v1449_v61  ;;  %v403_v3 = vmul.f32 %v991_v12, %v1451_v0 }
 0x10d   : > { %v883_v40 = vsel %vm325_vm2, 1.0, %v1134_v57  ;;  %v348_v42 = vsel %vm261_vm4, %v882_v31, 0.0  ;;  %vm320_vm11 = vmand %vm310_vm13, %vm314_vm5  ;;  %v1521_v59 = vadd.f32 %v296_v30, %v295_v23  ;;  %v429_v63 = vsel %vm261_vm4, %v892_v32, 0.0 }
 0x10e   : > { %v349_v43 = vsel %vm261_vm4, %v883_v40, 0.0  ;;  %vm321_vm12 = vmand %vm311_vm0, %vm315_vm1  ;;  %430 = vadd.xlane.f32.xlu1 %v429_v63  ;;  %v360_v5 = vrot.slane %v359_v29, 4  ;;  %992 = vtanh.f32 %v404_v4  ;;  %v405_v37 = vmul.f32 %v991_v12, %v1480_v17 }
 0x10f   : > { %v350_v44 = vadd.f32 %v349_v43, %v348_v42  ;;  %vm328_vm3 = vmor %vm302_vm9, %vm320_vm11  ;;  %vm304_vm8 = vcmp.gt.f32.partialorder %v1435_v34, %v1521_v59  ;;  %vm312_vm7 = vcmp.eq.f32.partialorder %v1435_v34, %v1521_v59  ;;  %vm313_vm13 = vcmp.eq.f32.partialorder %v1433_v33, %v1521_v59 }
 0x110   : > { %vm329_vm6 = vmor %vm303_vm10, %vm321_vm12  ;;  %v886_v45 = vsel %vm328_vm3, 1.0, %v1134_v57  ;;  %vm414_vm15 = vcmp.gt.f32.partialorder %v1521_v59, -inf  ;;  %vm305_vm9 = vcmp.gt.f32.partialorder %v1433_v33, %v1521_v59  ;;  %v914_v34 = vpack.c.bf16 %v1330_v13, %v1318_v9 }
 0x111   : > { %v887_v22 = vsel %vm329_vm6, 1.0, %v1134_v57  ;;  %v366_v46 = vsel %vm261_vm4, %v886_v45, 0.0  ;;  %vm322_vm10 = vmand %vm312_vm7, %vm314_vm5  ;;  %v893_v18 = vsel %vm414_vm15, 1.0, %v1134_v57  ;;  %v351_v9 = vrot.slane %v350_v44, 4 }
 0x112   : > { %v367_v47 = vsel %vm261_vm4, %v887_v22, 0.0  ;;  %vm323_vm0 = vmand %vm313_vm13, %vm315_vm1  ;;  %v432_v48 = vsel %vm261_vm4, %v893_v18, 0.0  ;;  %915 = vmatpush1.bf16.msra.mxu0 %v914_v34  ;;  %v361_v13 = vadd.f32 %v360_v5, %v359_v29  ;;  %994 = vtanh.f32 %v403_v3 }
 0x113   : > { %v368_v49 = vadd.f32 %v367_v47, %v366_v46  ;;  %vm330_vm14 = vmor %vm304_vm8, %vm322_vm10  ;;  %433 = vadd.xlane.f32.xlu0 %v432_v48  ;;  %921 = vmatprep.subr.bf16.mxu0 %v920_v60  ;;  %v352_v11 = vadd.f32 %v351_v9, %v350_v44  ;;  %996 = vtanh.f32 %v405_v37  ;;  %v406_v23 = vmul.f32 %v991_v12, %v1521_v59 }
 0x114   : > { %vm331_vm2 = vmor %vm305_vm9, %vm323_vm0  ;;  %v888_v33 = vsel %vm330_vm14, 1.0, %v1134_v57  ;;  %v362_v58 = vrot.slane %v361_v13, 2  ;;  %v435_v61 = vcvt.s32.f32 %v1304_v1 }
 0x115   : > { %v889_v50 = vsel %vm331_vm2, 1.0, %v1134_v57  ;;  %v375_v51 = vsel %vm261_vm4, %v888_v33, 0.0  ;;  %v369_v6 = vrot.slane %v368_v49, 4  ;;  %v353_v20 = vrot.slane %v352_v11, 2 }
 0x116   : > { %v376_v52 = vsel %vm261_vm4, %v889_v50, 0.0  ;;  %v363_v39 = vadd.f32 %v362_v58, %v361_v13  ;;  %998 = vtanh.f32 %v406_v23 }
 0x117   : > { %v377_v53 = vadd.f32 %v376_v52, %v375_v51  ;;  %v370_v26 = vadd.f32 %v369_v6, %v368_v49  ;;  %v354_v8 = vadd.f32 %v353_v20, %v352_v11 }
 0x118   : > { %v364_v24 = vrot.slane %v363_v39, 1  ;;  %v993_v27 = vpop.eup %992 }
 0x119   : > { %v378_v7 = vrot.slane %v377_v53, 4  ;;  %v371_v16 = vrot.slane %v370_v26, 2  ;;  %v355_v25 = vrot.slane %v354_v8, 1  ;;  %v455_v63 = vrot.slane %v993_v27, %v1307_v2 }
 0x11a   : > { %v365_v40 = vadd.f32 %v364_v24, %v363_v39 }
 0x11b   : > { %v379_v15 = vadd.f32 %v378_v7, %v377_v53  ;;  %v372_v29 = vadd.f32 %v371_v16, %v370_v26  ;;  %v356_v43 = vadd.f32 %v355_v25, %v354_v8 }
 0x11c   : > { %v995_v31 = vpop.eup %994 }
 0x11d   : > { %v380_v30 = vrot.slane %v379_v15, 2  ;;  %v373_v59 = vrot.slane %v372_v29, 1  ;;  %v451_v1 = vrot.slane %v995_v31, %v1307_v2  ;;  %v997_v46 = vpop.eup %996 }
 0x11e   : > { %v459_v50 = vrot.slane %v997_v46, %v1307_v2 }
 0x11f   : > { %v381_v44 = vadd.f32 %v380_v30, %v379_v15  ;;  %v374_v48 = vadd.f32 %v373_v59, %v372_v29 }
 0x120   : > { %v999_v52 = vpop.eup %998 }
 0x121   : > { %v382_v33 = vrot.slane %v381_v44, 1  ;;  %v463_v19 = vrot.slane %v999_v52, %v1307_v2 }
 0x123   : > { %v383_v38 = vadd.f32 %v382_v33, %v381_v44 }
 0x196   : > { %v428_v0 = vpop.xlane.xlu0 %427 }
 0x197   : > { %v425_v62 = vpop.xlane.xlu1 %424  ;;  %v895_v28 = vadd.f32 -1.0, %v428_v0 }
 0x198   : > { %v894_v17 = vadd.f32 -1.0, %v425_v62 }
 0x199   : > { %v441_v32 = vmin.f32 %v435_v61, %v895_v28 }
 0x19a   : > { %v440_v42 = vmin.f32 %v435_v61, %v894_v17 }
 0x19b   : > { %vm445_vm1 = vcmp.eq.f32.partialorder %v365_v40, %v441_v32  ;;  %v431_v45 = vpop.xlane.xlu1 %430 }
 0x19c   : > { %vm444_vm5 = vcmp.eq.f32.partialorder %v356_v43, %v440_v42  ;;  %v465_v22 = vsel %vm445_vm1, %v455_v63, 0.0  ;;  %v896_v18 = vadd.f32 -1.0, %v431_v45 }
 0x19d   : > { %v464_v47 = vsel %vm444_vm5, %v451_v1, 0.0  ;;  %899 = vmatmul.mubr.msk.f32.vlgmr.msra.gmra.mrb[0].mxu1 %vm261_vm4, %v465_v22 }
 0x19e   : > { %898 = vmatmul.mubr.msk.f32.vlgmr.msra.gmra.mrb[0].mxu0 %vm261_vm4, %v464_v47  ;;  %927 = vmatpush1.bf16.msra.mxu1 %v926_v41  ;;  %v442_v49 = vmin.f32 %v435_v61, %v896_v18 }
 0x19f   : > { %923 = vmatpush1.bf16.msra.mxu0 %v922_v35  ;;  %683 = vmatprep.mubr.f32.mxu0 %v1134_v57 }
 0x1a0   : > { %v434_v51 = vpop.xlane.xlu0 %433  ;;  %757 = vmatprep.mubr.f32.mxu1 %v1134_v57  ;;  %vm446_vm11 = vcmp.eq.f32.partialorder %v374_v48, %v442_v49 }
 0x1a1   : > { %v897_v53 = vadd.f32 -1.0, %v434_v51  ;;  %v466_v36 = vsel %vm446_vm11, %v459_v50, 0.0 }
 0x1a2   : > { %900 = vmatmul.mubr.msk.f32.vlgmr.msra.gmra.mrb[2].mxu0 %vm261_vm4, %v466_v36 }
 0x1a3   : > { %v443_v41 = vmin.f32 %v435_v61, %v897_v53 }
 0x1a5   : > { %vm447_vm12 = vcmp.eq.f32.partialorder %v383_v38, %v443_v41 }
 0x1a6   : > { %v467_v21 = vsel %vm447_vm12, %v463_v19, 0.0 }
 0x1a7   : > { %901 = vmatmul.mubr.msk.f32.vlgmr.msra.gmra.mrb[2].mxu1 %vm261_vm4, %v467_v21 }
 0x270   : > { %v611_v35 = vpop.f32.mrb[0].mxu1 }
 0x271   : > { %v537_v55 = vpop.f32.mrb[0].mxu0  ;;  %766 = vst [vmem:[%s175_s23 + $0x10] sm:$0xff] %v611_v35  ;;  %v613_v57 = vpop.f32.mrb[1].mxu1 }
 0x272   : > { %764 = vst [vmem:[%s175_s23] sm:$0xff] %v537_v55  ;;  %v539_v56 = vpop.f32.mrb[1].mxu0  ;;  %767 = vst [vmem:[%s175_s23 + $0x18] sm:$0xff] %v613_v57 }
 0x273   : > { %765 = vst [vmem:[%s175_s23 + $0x8] sm:$0xff] %v539_v56 }
 0x275   : > { %v685_v34 = vpop.f32.mrb[2].mxu0 }
 0x276   : > { %768 = vst [vmem:[%s175_s23 + $0x20] sm:$0xff] %v685_v34  ;;  %v687_v2 = vpop.f32.mrb[3].mxu0 }
 0x277   : > { %769 = vst [vmem:[%s175_s23 + $0x28] sm:$0xff] %v687_v2 }
 0x27a   : > { %v759_v54 = vpop.f32.mrb[2].mxu1 }
 0x27b   : > { %770 = vst [vmem:[%s175_s23 + $0x30] sm:$0xff] %v759_v54  ;;  %v761_v60 = vpop.f32.mrb[3].mxu1 }
 0x27c   : > { %771 = vst [vmem:[%s175_s23 + $0x38] sm:$0xff] %v761_v60 }
 0x27d   : > { %1071 = shalt.err (!%p1068_p13)
}
 0x27e   : > { %s1072_s17 = scalar_lea.hbm %s1602_s7, 1024  ;;  %s1076_s3 = scalar_lea.hbm %s1648_s2, 2048 }
 0x27f   : > { %p1073_p7 = scmp.ne.s32.totalorder %s1602_s7, %s1072_s17  ;;  %p1077_p1 = scmp.lt.u32.totalorder %s1602_s7, %s1648_s2 }
 0x280   : > { %p1078_p11 = scmp.lt.u32.totalorder %s1076_s3, %s1072_s17  ;;  %p1080_p9 = scmp.lt.u32.totalorder %s1072_s17, %s1602_s7 }
 0x281   : > { %p1074_p3 = pnand %p1073_p7, %p1667_p10 }
 0x282   : > { %p1079_p8 = por %p1078_p11, %p1077_p1 }
 0x283   : > { %p1075_p12 = pneg %p1074_p3 }
 0x284   : > { %p1081_p2 = por %p1080_p9, %p1079_p8 }
 0x286   : > { %p1082_p4 = pnand %p1081_p2, %p1075_p12 }
 0x288   : > { %1085 = shalt.err (!%p1082_p4)
}
 0x289   : > { %s1136_s29 = smov 256   ;;  %s1137_s20 = smov 16  }
 0x28a   : > { %934 = dma.vmem_to_hbm [thread:$0]  (%p1667_p10), %s1597_s28, 1024, %s1602_s7, %s773_s8, %s1136_s29, %s1136_s29, %s1137_s20  }
 0x28b PF: > { %s802_s23 = sand.u32 1, %s1116_s9   ;;  %p1668_p5 = scmp.ne.s32.totalorder %s1657_s22, 0 }
 0x28c   : > { %p1669_p0 = scmp.ge.s32.totalorder %s1128_s12, 2  ;;  %s803_s30 = scalar_lea.sflag [#allocation4], %s802_s23 }
 0x28e   : > { %p945_p6 = pnand %p1669_p0, %p1668_p5 }
 0x290   : > { %1111 = dma.done.wait (!%p945_p6), %s803_s30, 1024  }
 0x291   : > { %1113 = vsyncadd (!%p945_p6), %s803_s30, 4294966272  ;;  %p16_p13 = scmp.ge.s32.totalorder %s1178_s15, 4   ;;  %s1670_s9 = smov %s1120_s10 }
 0x292   : > { %s1671_s10 = smov %s1124_s11  ;;  %s1672_s11 = smov %s1190_s18 }
 0x293   : > { %s1673_s12 = smov %s1178_s15  ;;  %18 = sbr.rel (!%p16_p13) target bundleno = 6 (0x6), region = 77 }
 0x29a   :  { %808 = vsyncpa [#allocation3], 1 }
 0x29b   :  { %810 = vsyncpa [#allocation3 + $0x1], 1 }
 0x29c   :  { %811 = vsyncpa [#allocation6], 1 }
 0x29d   :  { %812 = vsyncpa [#allocation4], 1 }
 0x29e   :  { %814 = vsyncpa [#allocation4 + $0x1], 1 }

</bundles_post_ra>
